<compile_context>
chip_gen: v6e
topology: v6e:2x2x1
jax: 0.10.0
libtpu: 0.0.40
codegen_flags: <defaults>
</compile_context>

<pallas_src>
import functools

import jax
import jax.numpy as jnp
from jax.experimental import pallas as pl
from jax.experimental.pallas import tpu as pltpu


def _round_up(x, m):
    return (x + m - 1) // m * m


def _leaky_relu(x, slope=0.2):
    # max(x, slope*x) == LeakyReLU(slope) for slope in (0,1); cheaper than where.
    return jnp.maximum(x, slope * x)


def sen_dims(semantic_dim, feature_dim):
    hid1 = max(feature_dim * 2, (semantic_dim + feature_dim) // 2)
    hid1 = min(hid1, 512)
    hid2 = max(feature_dim, (hid1 + feature_dim) // 2)
    hid2 = min(hid2, max(feature_dim, 256))
    hid1 = max(hid1, hid2)
    hid2 = max(hid2, feature_dim)
    return hid1, hid2


# ----------------------------------------------------------------------------
# Kernel
# ----------------------------------------------------------------------------
def sen_kernel(x_ref,
               wcat_ref, bcat_ref,     # [w1*bn_scale | wr], [b1' | br]
               w2_ref, b2_ref,         # BN2 folded
               w3_ref, b3_ref,
               o_ref, *, hid1_p):
    # Input sanitation (matches torch.nan_to_num(nan=0.0) on the bf16 input).
    x = jnp.nan_to_num(x_ref[...], nan=0.0)

    # Fused layer-1 + residual matmul: both share the same tiny-K LHS, so one
    # MXU push instead of two.  f32 accumulation.
    y = jnp.dot(x, wcat_ref[...],
                preferred_element_type=jnp.float32) + bcat_ref[...]
    residual = y[:, hid1_p:]              # residual branch (128-lane aligned)
    # Finiteness guard computed early so the full-tile reduction overlaps the
    # following matmuls instead of gating the output store.
    # TODO(synk): torch's guard is batch-global; with >1 grid step this guard
    # is per batch tile (identical when the whole batch is one tile).
    res_ok = jnp.all(jnp.isfinite(residual))

    h = _leaky_relu(y[:, :hid1_p])        # embedding layer 1 (BN folded)

    # Embedding layer 2 (BN folded) + LeakyReLU.  Dropout = identity (eval).
    h = jnp.dot(h.astype(w2_ref.dtype), w2_ref[...],
                preferred_element_type=jnp.float32) + b2_ref[...]
    h = _leaky_relu(h)

    # Embedding output layer.
    embedded = jnp.dot(h.astype(w3_ref.dtype), w3_ref[...],
                       preferred_element_type=jnp.float32) + b3_ref[...]
    emb_ok = jnp.all(jnp.isfinite(embedded))

    out = (jnp.where(emb_ok, embedded, 0.0)
           + jnp.where(res_ok, residual, 0.0))
    out = jnp.nan_to_num(out, nan=0.0)
    o_ref[...] = out.astype(o_ref.dtype)


# ----------------------------------------------------------------------------
# Parameter construction (raw torch-style params, then fold/pad/fuse/cast)
# ----------------------------------------------------------------------------
def init_raw_params(key, semantic_dim, feature_dim):
    hid1, hid2 = sen_dims(semantic_dim, feature_dim)
    ks = jax.random.split(key, 12)

    def lin(kw, kb, din, dout):
        bound = 1.0 / float(din) ** 0.5
        w = jax.random.uniform(kw, (din, dout), jnp.float32, -bound, bound)
        b = jax.random.uniform(kb, (1, dout), jnp.float32, -bound, bound)
        return w, b

    w1, b1 = lin(ks[0], ks[1], semantic_dim, hid1)
    w2, b2 = lin(ks[2], ks[3], hid1, hid2)
    w3, b3 = lin(ks[4], ks[5], hid2, feature_dim)
    wr, br = lin(ks[6], ks[7], semantic_dim, feature_dim)

    def bn(kg, kb_, dim):
        gamma = 1.0 + 0.1 * jax.random.normal(kg, (1, dim), jnp.float32)
        beta = 0.1 * jax.random.normal(kb_, (1, dim), jnp.float32)
        mean = jnp.zeros((1, dim), jnp.float32)
        var = jnp.ones((1, dim), jnp.float32)
        return gamma, beta, mean, var

    return dict(w1=w1, b1=b1, bn1=bn(ks[8], ks[9], hid1),
                w2=w2, b2=b2, bn2=bn(ks[10], ks[11], hid2),
                w3=w3, b3=b3, wr=wr, br=br,
                dims=(semantic_dim, hid1, hid2, feature_dim))


def prepare_kernel_params(raw, *, param_dtype=jnp.bfloat16, eps=1e-5):
    semantic_dim, hid1, hid2, feature_dim = raw["dims"]
    hid1_p = _round_up(hid1, 128)
    hid2_p = _round_up(hid2, 128)
    feat_p = _round_up(feature_dim, 128)

    def fold(w, b, gamma, beta, mean, var):
        # Eval-mode BatchNorm1d folded into the preceding Linear.
        scale = gamma / jnp.sqrt(var + eps)              # (1, dout)
        return w * scale, b * scale + (beta - mean * scale)

    w1f, b1f = fold(raw["w1"], raw["b1"], *raw["bn1"])
    w2f, b2f = fold(raw["w2"], raw["b2"], *raw["bn2"])

    def pad2(a, rows, cols):
        return jnp.pad(a, ((0, rows - a.shape[0]), (0, cols - a.shape[1])))

    # Fuse layer-1 and residual (shared LHS x) into one lane-dense matmul.
    wcat = jnp.concatenate([pad2(w1f, semantic_dim, hid1_p),
                            pad2(raw["wr"], semantic_dim, feat_p)], axis=1)
    bcat = jnp.concatenate([pad2(b1f, 1, hid1_p),
                            pad2(raw["br"], 1, feat_p)], axis=1)

    w2p = pad2(w2f, hid1_p, hid2_p)
    b2p = pad2(b2f, 1, hid2_p)
    w3p = pad2(raw["w3"], hid2_p, feat_p)
    b3p = pad2(raw["b3"], 1, feat_p)

    return dict(
        wcat=wcat.astype(param_dtype), bcat=bcat.astype(jnp.float32),
        w2=w2p.astype(param_dtype), b2=b2p.astype(jnp.float32),
        w3=w3p.astype(param_dtype), b3=b3p.astype(jnp.float32),
        hid1_p=hid1_p, hid2_p=hid2_p, feat_p=feat_p,
        semantic_dim=semantic_dim, feature_dim=feature_dim)


# ----------------------------------------------------------------------------
# Forward wrapper
# ----------------------------------------------------------------------------
def semantic_embedding_forward(semantic, kp, *, max_batch_tile=2048,
                               out_dtype=jnp.bfloat16, keep_padded=False):
    B, semantic_dim = semantic.shape
    assert semantic_dim == kp["semantic_dim"]
    hid1_p, hid2_p, feat_p = kp["hid1_p"], kp["hid2_p"], kp["feat_p"]

    # Batch tiling:
    #  * at least 2 grid steps so v7x's "parallel" axis shards across both TCs
    #    (collapses back to 1 step for tiny batches after alignment),
    #  * tile sized from the batch so padding waste stays under one ALIGN group,
    #  * ALIGN=16 keeps bf16 input/output blocks sublane-packed.
    ALIGN = 16
    n_steps = max(2, pl.cdiv(B, max_batch_tile))
    tb = max(_round_up(pl.cdiv(B, n_steps), ALIGN), ALIGN)
    b_pad = _round_up(B, tb)

    # bf16 input halves the input DMA; K=semantic_dim stays unpadded.
    x = semantic.astype(jnp.bfloat16)
    if b_pad != B:
        x = jnp.pad(x, ((0, b_pad - B), (0, 0)))

    def full(a):  # weights: whole array, VMEM-resident across grid steps
        return pl.BlockSpec(a.shape, lambda i: (0, 0))

    # Explicit scoped-VMEM budget (matters on v5e, 16 MiB default) sized for
    # the f32 intermediates (~4.5 KiB/row) plus weights + double buffers.
    vmem_limit = int(min(max(tb * 8192 + (2 << 20), 16 << 20), 48 << 20))

    wbytes = sum(int(kp[k].size) * kp[k].dtype.itemsize
                 for k in ("wcat", "bcat", "w2", "b2", "w3", "b3"))
    flops = 2 * b_pad * (semantic_dim * (hid1_p + feat_p)
                         + hid1_p * hid2_p + hid2_p * feat_p)
    bytes_accessed = (b_pad * semantic_dim * 2
                      + b_pad * feat_p * jnp.dtype(out_dtype).itemsize
                      + wbytes)

    out = pl.pallas_call(
        functools.partial(sen_kernel, hid1_p=hid1_p),
        out_shape=jax.ShapeDtypeStruct((b_pad, feat_p), out_dtype),
        grid=(b_pad // tb,),
        in_specs=[
            pl.BlockSpec((tb, semantic_dim), lambda i: (i, 0)),
            full(kp["wcat"]), full(kp["bcat"]),
            full(kp["w2"]), full(kp["b2"]),
            full(kp["w3"]), full(kp["b3"]),
        ],
        out_specs=pl.BlockSpec((tb, feat_p), lambda i: (i, 0)),
        compiler_params=pltpu.CompilerParams(
            dimension_semantics=("parallel",),
            vmem_limit_bytes=vmem_limit),
        cost_estimate=pl.CostEstimate(flops=flops, transcendentals=0,
                                      bytes_accessed=bytes_accessed),
    )(x, kp["wcat"], kp["bcat"], kp["w2"], kp["b2"], kp["w3"], kp["b3"])

    if keep_padded:
        # (b_pad, feat_p); lanes >= feature_dim are exact zeros, rows >= B are
        # padding.  Avoids the extra HBM pass of the host-side slice below.
        return out
    return out[:B, :kp["feature_dim"]]


# Pure-JAX reference using the same folded/padded/quantized params (only
# accumulation order and the final output-dtype cast differ from the kernel).
def reference_forward(x, kp):
    pd = kp["wcat"].dtype

    def q(a):
        return a.astype(pd).astype(jnp.float32)

    xs = jnp.nan_to_num(x.astype(jnp.bfloat16), nan=0.0).astype(jnp.float32)
    y = xs @ kp["wcat"].astype(jnp.float32) + kp["bcat"]
    h = _leaky_relu(y[:, :kp["hid1_p"]])
    residual = y[:, kp["hid1_p"]:]
    h = _leaky_relu(q(h) @ kp["w2"].astype(jnp.float32) + kp["b2"])
    embedded = q(h) @ kp["w3"].astype(jnp.float32) + kp["b3"]
    embedded = jnp.where(jnp.all(jnp.isfinite(embedded)), embedded, 0.0)
    residual = jnp.where(jnp.all(jnp.isfinite(residual)), residual, 0.0)
    out = jnp.nan_to_num(embedded + residual, nan=0.0)
    return out[:, :kp["feature_dim"]]


if __name__ == "__main__":
    # semantic_dim=32, feature_dim=64, batch=8  ->  SEN Arch: 32->128->96->64
    semantic_dim, feature_dim, batch = 32, 64, 8

    key = jax.random.PRNGKey(0)
    k_params, k_x = jax.random.split(key)
    raw = init_raw_params(k_params, semantic_dim, feature_dim)
    kp = prepare_kernel_params(raw, param_dtype=jnp.bfloat16)

    x = jax.random.normal(k_x, (batch, semantic_dim), jnp.float32)

    out = semantic_embedding_forward(x, kp)
    out = jax.block_until_ready(out)

    ref = reference_forward(x, kp)
    out_f32 = out.astype(jnp.float32)
    assert out.shape == (batch, feature_dim)
    assert bool(jnp.all(jnp.isfinite(out_f32)))
    assert bool(jnp.allclose(out_f32, ref, rtol=2e-2, atol=2e-2))
    print("KERNEL_OK")
</pallas_src>

<mosaic_0001>
module attributes {stable_mosaic.version = 11 : i64} {
  func.func @sen_kernel(%arg0: i32, %arg1: memref<16x32xbf16, #tpu.memory_space<vmem>>, %arg2: memref<32x256xbf16, #tpu.memory_space<vmem>>, %arg3: memref<1x256xf32, #tpu.memory_space<vmem>>, %arg4: memref<128x128xbf16, #tpu.memory_space<vmem>>, %arg5: memref<1x128xf32, #tpu.memory_space<vmem>>, %arg6: memref<128x128xbf16, #tpu.memory_space<vmem>>, %arg7: memref<1x128xf32, #tpu.memory_space<vmem>>, %arg8: memref<16x128xbf16, #tpu.memory_space<vmem>>) attributes {dimension_semantics = [#tpu.dimension_semantics<parallel>], iteration_bounds = array<i64: 1>, scalar_prefetch = 0 : i64, scratch_operands = 0 : i64, tpu.core_type = #tpu.core_type<tc>, window_params = [{transform_indices = @transform_0, window_bounds = array<i64: 16, 32>}, {pipeline_mode = #tpu.pipeline_mode<synchronous>, transform_indices = @transform_1, window_bounds = array<i64: 32, 256>}, {pipeline_mode = #tpu.pipeline_mode<synchronous>, transform_indices = @transform_2, window_bounds = array<i64: 1, 256>}, {pipeline_mode = #tpu.pipeline_mode<synchronous>, transform_indices = @transform_3, window_bounds = array<i64: 128, 128>}, {pipeline_mode = #tpu.pipeline_mode<synchronous>, transform_indices = @transform_4, window_bounds = array<i64: 1, 128>}, {pipeline_mode = #tpu.pipeline_mode<synchronous>, transform_indices = @transform_5, window_bounds = array<i64: 128, 128>}, {pipeline_mode = #tpu.pipeline_mode<synchronous>, transform_indices = @transform_6, window_bounds = array<i64: 1, 128>}, {transform_indices = @transform_7, window_bounds = array<i64: 16, 128>}]} {
    %c0 = arith.constant 0 : index
    %c0_0 = arith.constant 0 : index
    %0 = vector.load %arg1[%c0, %c0_0] : memref<16x32xbf16, #tpu.memory_space<vmem>>, vector<16x32xbf16>
    %cst = arith.constant 0.000000e+00 : f32
    %1 = arith.cmpf one, %0, %0 : vector<16x32xbf16>
    %2 = arith.truncf %cst : f32 to bf16
    %3 = vector.broadcast %2 : bf16 to vector<16x32xbf16>
    %4 = arith.select %1, %3, %0 : vector<16x32xi1>, vector<16x32xbf16>
    %cst_1 = arith.constant 0x7F80 : bf16
    %5 = vector.broadcast %cst_1 : bf16 to vector<16x32xbf16>
    %6 = arith.cmpf oeq, %4, %5 : vector<16x32xbf16>
    %cst_2 = arith.constant 3.389530e+38 : bf16
    %7 = vector.broadcast %cst_2 : bf16 to vector<16x32xbf16>
    %8 = arith.select %6, %7, %4 : vector<16x32xi1>, vector<16x32xbf16>
    %cst_3 = arith.constant 0xFF80 : bf16
    %9 = vector.broadcast %cst_3 : bf16 to vector<16x32xbf16>
    %10 = arith.cmpf oeq, %8, %9 : vector<16x32xbf16>
    %cst_4 = arith.constant -3.389530e+38 : bf16
    %11 = vector.broadcast %cst_4 : bf16 to vector<16x32xbf16>
    %12 = arith.select %10, %11, %8 : vector<16x32xi1>, vector<16x32xbf16>
    %c0_5 = arith.constant 0 : index
    %c0_6 = arith.constant 0 : index
    %13 = vector.load %arg2[%c0_5, %c0_6] : memref<32x256xbf16, #tpu.memory_space<vmem>>, vector<32x256xbf16>
    %cst_7 = arith.constant dense<0.000000e+00> : vector<16x256xf32>
    %14 = tpu.matmul %12, %13, %cst_7 {dimension_numbers = #tpu.dot_dimension_numbers<[1], [0], [0], [1], [0, 0, 1, 1], [], []>} : vector<16x32xbf16>, vector<32x256xbf16>, vector<16x256xf32> -> vector<16x256xf32>
    %c0_8 = arith.constant 0 : index
    %c0_9 = arith.constant 0 : index
    %15 = vector.load %arg3[%c0_8, %c0_9] : memref<1x256xf32, #tpu.memory_space<vmem>>, vector<1x256xf32>
    %16 = vector.broadcast %15 : vector<1x256xf32> to vector<16x256xf32>
    %17 = arith.addf %14, %16 : vector<16x256xf32>
    %18 = vector.extract_strided_slice %17 {offsets = [0, 128], sizes = [16, 128], strides = [1, 1]} : vector<16x256xf32> to vector<16x128xf32>
    %19 = tpu.weird %18 : vector<16x128xf32> -> vector<16x128xi1>
    %cst_10 = arith.constant dense<true> : vector<16x128xi1>
    %20 = arith.xori %19, %cst_10 : vector<16x128xi1>
    %cst_11 = arith.constant 1.000000e+00 : f32
    %cst_12 = arith.constant 0.000000e+00 : f32
    %21 = vector.broadcast %cst_11 : f32 to vector<16x128xf32>
    %22 = vector.broadcast %cst_12 : f32 to vector<16x128xf32>
    %23 = arith.select %20, %21, %22 : vector<16x128xi1>, vector<16x128xf32>
    %24 = vector.shape_cast %23 : vector<16x128xf32> to vector<1x16x128xf32>
    %cst_13 = arith.constant dense<0x7F800000> : vector<1xf32>
    %25 = vector.multi_reduction <minimumf>, %24, %cst_13 [1, 2] : vector<1x16x128xf32> to vector<1xf32>
    %26 = vector.shape_cast %25 : vector<1xf32> to vector<1x1x1xf32>
    %27 = vector.extract %26[0, 0, 0] : f32 from vector<1x1x1xf32>
    %cst_14 = arith.constant 0.000000e+00 : f32
    %28 = arith.cmpf ogt, %27, %cst_14 : f32
    %29 = vector.extract_strided_slice %17 {offsets = [0, 0], sizes = [16, 128], strides = [1, 1]} : vector<16x256xf32> to vector<16x128xf32>
    %cst_15 = arith.constant 2.000000e-01 : f32
    %30 = vector.broadcast %cst_15 : f32 to vector<16x128xf32>
    %31 = arith.mulf %30, %29 : vector<16x128xf32>
    %32 = arith.maximumf %29, %31 : vector<16x128xf32>
    %33 = arith.truncf %32 : vector<16x128xf32> to vector<16x128xbf16>
    %c0_16 = arith.constant 0 : index
    %c0_17 = arith.constant 0 : index
    %34 = vector.load %arg4[%c0_16, %c0_17] : memref<128x128xbf16, #tpu.memory_space<vmem>>, vector<128x128xbf16>
    %cst_18 = arith.constant dense<0.000000e+00> : vector<16x128xf32>
    %35 = tpu.matmul %33, %34, %cst_18 {dimension_numbers = #tpu.dot_dimension_numbers<[1], [0], [0], [1], [0, 0, 1, 1], [], []>} : vector<16x128xbf16>, vector<128x128xbf16>, vector<16x128xf32> -> vector<16x128xf32>
    %c0_19 = arith.constant 0 : index
    %c0_20 = arith.constant 0 : index
    %36 = vector.load %arg5[%c0_19, %c0_20] : memref<1x128xf32, #tpu.memory_space<vmem>>, vector<1x128xf32>
    %37 = vector.broadcast %36 : vector<1x128xf32> to vector<16x128xf32>
    %38 = arith.addf %35, %37 : vector<16x128xf32>
    %cst_21 = arith.constant 2.000000e-01 : f32
    %39 = vector.broadcast %cst_21 : f32 to vector<16x128xf32>
    %40 = arith.mulf %39, %38 : vector<16x128xf32>
    %41 = arith.maximumf %38, %40 : vector<16x128xf32>
    %42 = arith.truncf %41 : vector<16x128xf32> to vector<16x128xbf16>
    %c0_22 = arith.constant 0 : index
    %c0_23 = arith.constant 0 : index
    %43 = vector.load %arg6[%c0_22, %c0_23] : memref<128x128xbf16, #tpu.memory_space<vmem>>, vector<128x128xbf16>
    %cst_24 = arith.constant dense<0.000000e+00> : vector<16x128xf32>
    %44 = tpu.matmul %42, %43, %cst_24 {dimension_numbers = #tpu.dot_dimension_numbers<[1], [0], [0], [1], [0, 0, 1, 1], [], []>} : vector<16x128xbf16>, vector<128x128xbf16>, vector<16x128xf32> -> vector<16x128xf32>
    %c0_25 = arith.constant 0 : index
    %c0_26 = arith.constant 0 : index
    %45 = vector.load %arg7[%c0_25, %c0_26] : memref<1x128xf32, #tpu.memory_space<vmem>>, vector<1x128xf32>
    %46 = vector.broadcast %45 : vector<1x128xf32> to vector<16x128xf32>
    %47 = arith.addf %44, %46 : vector<16x128xf32>
    %48 = tpu.weird %47 : vector<16x128xf32> -> vector<16x128xi1>
    %cst_27 = arith.constant dense<true> : vector<16x128xi1>
    %49 = arith.xori %48, %cst_27 : vector<16x128xi1>
    %cst_28 = arith.constant 1.000000e+00 : f32
    %cst_29 = arith.constant 0.000000e+00 : f32
    %50 = vector.broadcast %cst_28 : f32 to vector<16x128xf32>
    %51 = vector.broadcast %cst_29 : f32 to vector<16x128xf32>
    %52 = arith.select %49, %50, %51 : vector<16x128xi1>, vector<16x128xf32>
    %53 = vector.shape_cast %52 : vector<16x128xf32> to vector<1x16x128xf32>
    %cst_30 = arith.constant dense<0x7F800000> : vector<1xf32>
    %54 = vector.multi_reduction <minimumf>, %53, %cst_30 [1, 2] : vector<1x16x128xf32> to vector<1xf32>
    %55 = vector.shape_cast %54 : vector<1xf32> to vector<1x1x1xf32>
    %56 = vector.extract %55[0, 0, 0] : f32 from vector<1x1x1xf32>
    %cst_31 = arith.constant 0.000000e+00 : f32
    %57 = arith.cmpf ogt, %56, %cst_31 : f32
    %cst_32 = arith.constant 0.000000e+00 : f32
    %58 = vector.broadcast %cst_32 : f32 to vector<16x128xf32>
    %59 = arith.select %57, %47, %58 : vector<16x128xf32>
    %cst_33 = arith.constant 0.000000e+00 : f32
    %60 = vector.broadcast %cst_33 : f32 to vector<16x128xf32>
    %61 = arith.select %28, %18, %60 : vector<16x128xf32>
    %62 = arith.addf %59, %61 : vector<16x128xf32>
    %cst_34 = arith.constant 0.000000e+00 : f32
    %63 = arith.cmpf one, %62, %62 : vector<16x128xf32>
    %64 = vector.broadcast %cst_34 : f32 to vector<16x128xf32>
    %65 = arith.select %63, %64, %62 : vector<16x128xi1>, vector<16x128xf32>
    %cst_35 = arith.constant 0x7F800000 : f32
    %66 = vector.broadcast %cst_35 : f32 to vector<16x128xf32>
    %67 = arith.cmpf oeq, %65, %66 : vector<16x128xf32>
    %cst_36 = arith.constant 3.40282347E+38 : f32
    %68 = vector.broadcast %cst_36 : f32 to vector<16x128xf32>
    %69 = arith.select %67, %68, %65 : vector<16x128xi1>, vector<16x128xf32>
    %cst_37 = arith.constant 0xFF800000 : f32
    %70 = vector.broadcast %cst_37 : f32 to vector<16x128xf32>
    %71 = arith.cmpf oeq, %69, %70 : vector<16x128xf32>
    %cst_38 = arith.constant -3.40282347E+38 : f32
    %72 = vector.broadcast %cst_38 : f32 to vector<16x128xf32>
    %73 = arith.select %71, %72, %69 : vector<16x128xi1>, vector<16x128xf32>
    %74 = arith.truncf %73 : vector<16x128xf32> to vector<16x128xbf16>
    %c0_39 = arith.constant 0 : index
    %c0_40 = arith.constant 0 : index
    %75 = vector.load %arg8[%c0_39, %c0_40] : memref<16x128xbf16, #tpu.memory_space<vmem>>, vector<16x128xbf16>
    tpu.vector_store %arg8[%c0_39, %c0_40], %74 {strides = array<i32>} : memref<16x128xbf16, #tpu.memory_space<vmem>>, vector<16x128xbf16>,
    return
  }
  func.func @transform_0(%arg0: i32) -> (i32, i32) {
    %c0_i32 = arith.constant 0 : i32
    %c0_i32_0 = arith.constant 0 : i32
    return %arg0, %c0_i32 : i32, i32
  }
  func.func @transform_1(%arg0: i32) -> (i32, i32) {
    %c0_i32 = arith.constant 0 : i32
    %c0_i32_0 = arith.constant 0 : i32
    %c0_i32_1 = arith.constant 0 : i32
    return %c0_i32, %c0_i32_0 : i32, i32
  }
  func.func @transform_2(%arg0: i32) -> (i32, i32) {
    %c0_i32 = arith.constant 0 : i32
    %c0_i32_0 = arith.constant 0 : i32
    %c0_i32_1 = arith.constant 0 : i32
    return %c0_i32, %c0_i32_0 : i32, i32
  }
  func.func @transform_3(%arg0: i32) -> (i32, i32) {
    %c0_i32 = arith.constant 0 : i32
    %c0_i32_0 = arith.constant 0 : i32
    %c0_i32_1 = arith.constant 0 : i32
    return %c0_i32, %c0_i32_0 : i32, i32
  }
  func.func @transform_4(%arg0: i32) -> (i32, i32) {
    %c0_i32 = arith.constant 0 : i32
    %c0_i32_0 = arith.constant 0 : i32
    %c0_i32_1 = arith.constant 0 : i32
    return %c0_i32, %c0_i32_0 : i32, i32
  }
  func.func @transform_5(%arg0: i32) -> (i32, i32) {
    %c0_i32 = arith.constant 0 : i32
    %c0_i32_0 = arith.constant 0 : i32
    %c0_i32_1 = arith.constant 0 : i32
    return %c0_i32, %c0_i32_0 : i32, i32
  }
  func.func @transform_6(%arg0: i32) -> (i32, i32) {
    %c0_i32 = arith.constant 0 : i32
    %c0_i32_0 = arith.constant 0 : i32
    %c0_i32_1 = arith.constant 0 : i32
    return %c0_i32, %c0_i32_0 : i32, i32
  }
  func.func @transform_7(%arg0: i32) -> (i32, i32) {
    %c0_i32 = arith.constant 0 : i32
    %c0_i32_0 = arith.constant 0 : i32
    return %arg0, %c0_i32 : i32, i32
  }
}

</mosaic_0001>

<bundles_post_ra>
// kernel: tpu_custom_call.1
= control target key start
LH: loop header
LB: loop body
LE: loop exit
PB: predicated region body
PF: predicated region fallthrough
CT: control target
= control target key end

     0   :  { %12 = vsyncpa [#allocation3], 0  ;;  %s871_s0 = inlined_call_operand.hbm [shape: bf16[16,32], index: 0, kind: input, shape index: {}]   ;;  %s872_s1 = inlined_call_operand.hbm [shape: bf16[32,256], index: 1, kind: input, shape index: {}]   ;;  %s873_s2 = inlined_call_operand.vmem [shape: f32[1,256], index: 2, kind: input, shape index: {}]   ;;  %s874_s3 = inlined_call_operand.hbm [shape: bf16[128,128], index: 3, kind: input, shape index: {}]   ;;  %s875_s4 = inlined_call_operand.vmem [shape: f32[1,128], index: 4, kind: input, shape index: {}]   ;;  %s876_s5 = inlined_call_operand.hbm [shape: bf16[128,128], index: 5, kind: input, shape index: {}]   ;;  %s877_s6 = inlined_call_operand.vmem [shape: f32[1,128], index: 6, kind: input, shape index: {}]   ;;  %s878_s7 = inlined_call_operand.hbm [shape: bf16[16,128], index: 7, kind: output, shape index: {}]  }
   0x1   :  { %13 = vsyncpa [#allocation6], 0 }
   0x2   :  { %14 = vsyncpa [#allocation9], 0 }
   0x3   :  { %15 = vsyncpa [#allocation4], 0  ;;  %s748_s24 = smov [#allocation5]  }
   0x4   :  { %s33_s25 = sshll.u32 %s748_s24, 4  ;;  %s34_s25 = int_to_ptr.vmem [resolvable:$true] %s33_s25 }
   0x5   :  { %s648_s26 = scalar_lea.vmem %s34_s25, 512  ;;  %p653_p1 = scmp.lt.s32.totalorder %s34_s25, %s34_s25 }
   0x6   :  { %p649_p0 = scmp.ne.s32.totalorder %s34_s25, %s648_s26  ;;  %p654_p2 = scmp.lt.s32.totalorder %s648_s26, %s648_s26 }
   0x8   :  { %p655_p3 = por %p654_p2, %p653_p1 }
   0xa   :  { %p656_p4 = pnand %p655_p3, %p649_p0 }
   0xc   :  { %659 = shalt.err (!%p656_p4)
}
   0xd   :  { %s749_s27 = smov 128   ;;  %s750_s28 = smov 8  }
   0xe   :  { %39 = dma.hbm_to_vmem [thread:$0]  %s872_s1, 512, %s34_s25, [#allocation6], %s749_s27, %s749_s27, %s750_s28  }
   0xf   :  { %s751_s8 = smov [#allocation2]  }
  0x10   :  { %s21_s9 = sshll.u32 %s751_s8, 4  ;;  %s22_s9 = int_to_ptr.vmem [resolvable:$true] %s21_s9 }
  0x11   :  { %s668_s10 = scalar_lea.vmem %s22_s9, 128  ;;  %p673_p6 = scmp.lt.s32.totalorder %s22_s9, %s22_s9 }
  0x12   :  { %p669_p5 = scmp.ne.s32.totalorder %s22_s9, %s668_s10  ;;  %p674_p7 = scmp.lt.s32.totalorder %s668_s10, %s668_s10 }
  0x14   :  { %p675_p8 = por %p674_p7, %p673_p6 }
  0x16   :  { %p676_p9 = pnand %p675_p8, %p669_p5 }
  0x18   :  { %679 = shalt.err (!%p676_p9)
}
  0x19   :  { %s752_s11 = smov 64   ;;  %s753_s12 = smov 4  }
  0x1a   :  { %27 = dma.hbm_to_vmem [thread:$0]  %s871_s0, 128, %s22_s9, [#allocation3], %s752_s11, %s752_s11, %s753_s12  }
  0x1b   :  { %s754_s1 = smov [#allocation7]   ;;  %s755_s16 = smov [#allocation8]  }
  0x1c   :  { %s47_s15 = sshll.u32 %s754_s1, 4  ;;  %s61_s17 = sshll.u32 %s755_s16, 4  ;;  %s48_s15 = int_to_ptr.vmem [resolvable:$true] %s47_s15  ;;  %s62_s17 = int_to_ptr.vmem [resolvable:$true] %s61_s17 }
  0x1d   :  { %s688_s18 = scalar_lea.vmem %s48_s15, 1024  ;;  %p693_p11 = scmp.lt.s32.totalorder %s48_s15, %s48_s15 }
  0x1e   :  { %p689_p10 = scmp.ne.s32.totalorder %s48_s15, %s688_s18  ;;  %p694_p12 = scmp.lt.s32.totalorder %s688_s18, %s688_s18 }
  0x20   :  { %p695_p13 = por %p694_p12, %p693_p11 }
  0x22   :  { %p696_p0 = pnand %p695_p13, %p689_p10 }
  0x24   :  { %699 = shalt.err (!%p696_p0)
}
  0x25   :  { %53 = dma.hbm_to_vmem [thread:$0]  %s874_s3, 1024, %s48_s15, [#allocation6], %s752_s11, %s752_s11, %s753_s12  }
  0x26   :  { %s708_s0 = scalar_lea.vmem %s62_s17, 1024  ;;  %p713_p2 = scmp.lt.s32.totalorder %s62_s17, %s62_s17 }
  0x27   :  { %p709_p1 = scmp.ne.s32.totalorder %s62_s17, %s708_s0  ;;  %p714_p3 = scmp.lt.s32.totalorder %s708_s0, %s708_s0 }
  0x29   :  { %p715_p4 = por %p714_p3, %p713_p2 }
  0x2b   :  { %p716_p5 = pnand %p715_p4, %p709_p1 }
  0x2d   :  { %719 = shalt.err (!%p716_p5)
}
  0x2e   :  { %67 = dma.hbm_to_vmem [thread:$0]  %s876_s5, 1024, %s62_s17, [#allocation9], %s752_s11, %s752_s11, %s753_s12  }
  0x2f   :  { %740 = dma.done.wait [#allocation3], 128  }
  0x30   :  { %741 = vsyncadd [#allocation3], 4294967168 }
  0x31   :  { %742 = dma.done.wait [#allocation6], 1536  }
  0x32   :  { %743 = vsyncadd [#allocation6], 4294965760 }
  0x33   :  { %744 = dma.done.wait [#allocation9], 1024  }
  0x34   :  { %745 = vsyncadd [#allocation9], 4294966272  ;;  %v756_v0 = vmov 0   ;;  %v757_v1 = vmov 0.0   ;;  %v618_v2 = vld [vmem:[#allocation5 + $0x14] ss:$8 sps:$4 sm:$0xff]   ;;  %v107_v23 = vlaneseq }
  0x35   :  { %178 = vmatprep.mubr.bf16.mxu0 %v756_v0  ;;  %561 = vmatprep.subr.bf16.mxu1 %v757_v1  ;;  %v620_v3 = vld [vmem:[#allocation5 + $0x10] ss:$8 sps:$4 sm:$0xff]   ;;  %v621_v4 = vld [vmem:[#allocation5 + $0x4] ss:$8 sps:$4 sm:$0xff]   ;;  %v623_v5 = vld [vmem:[#allocation5] ss:$8 sps:$4 sm:$0xff]  }
  0x36   :  { %158 = vmatprep.subr.bf16.mxu0 %v618_v2  ;;  %v87_v6 = vld [vmem:[#allocation2] sm:$0xf]  ;;  %v88_v7 = vld [vmem:[#allocation2 + $0x4] sm:$0xf]  ;;  %v625_v11 = vld [vmem:[#allocation7 + $0x30] sm:$0xff]   ;;  %vm142_vm5 = vcmask 261120  }
  0x37   :  { %159 = vmatpush1.bf16.msra.mxu0 %v620_v3  ;;  %vm89_vm0 = vcmp.ne.bf16.partialorder %v87_v6, %v87_v6  ;;  %vm90_vm1 = vcmp.ne.bf16.partialorder %v88_v7, %v88_v7  ;;  %v624_v9 = vld [vmem:[#allocation7 + $0x38] sm:$0xff]   ;;  %v626_v17 = vld [vmem:[#allocation7 + $0x28] sm:$0xff]   ;;  %v627_v18 = vld [vmem:[#allocation7 + $0x20] sm:$0xff]   ;;  %vm758_vm7 = vmmov 0   ;;  %v108_v24 = vshrl.u32 %v107_v23, 7  ;;  %s760_s28 = smov [#allocation10]  }
  0x38   :  { %160 = vmatprep.subr.bf16.mxu0 %v621_v4  ;;  %v91_v8 = vsel %vm89_vm0, 0, %v87_v6  ;;  %v92_v10 = vsel %vm90_vm1, 0, %v88_v7  ;;  %562 = vmatpush3.bf16.msra.mxu1 %v624_v9  ;;  %v628_v19 = vld [vmem:[#allocation7 + $0x18] sm:$0xff]   ;;  %v629_v20 = vld [vmem:[#allocation7 + $0x10] sm:$0xff]   ;;  %v630_v21 = vld [vmem:[#allocation7 + $0x8] sm:$0xff]   ;;  %vm759_vm9 = vmmov 1  }
  0x39   :  { %vm93_vm2 = vcmp.eq.bf16.partialorder %v91_v8, 2139127680  ;;  %vm94_vm3 = vcmp.eq.bf16.partialorder %v92_v10, 2139127680  ;;  %563 = vmatprep.subr.bf16.mxu1 %v757_v1  ;;  %v631_v22 = vld [vmem:[#allocation7] sm:$0xff]   ;;  %577 = vmatprep.mubr.msk.bf16.mxu1 %vm758_vm7, %v757_v1  ;;  %v109_v25 = vsub.s32 0, %v108_v24 }
  0x3a   :  { %v95_v12 = vsel %vm93_vm2, 2139062143, %v91_v8  ;;  %v96_v13 = vsel %vm94_vm3, 2139062143, %v92_v10  ;;  %v105_v26 = vld [vmem:[%s873_s2] sm:$0x3] }
  0x3b   :  { %161 = vmatpush1.bf16.msra.mxu0 %v623_v5  ;;  %vm97_vm4 = vcmp.eq.bf16.partialorder %v95_v12, 4286644096  ;;  %vm98_vm6 = vcmp.eq.bf16.partialorder %v96_v13, 4286644096  ;;  %v113_v27 = vsub.s32 1, %v108_v24  ;;  %v110_v28 = vrot.slane %v105_v26, %v109_v25  ;;  %v632_v46 = vld [vmem:[#allocation8 + $0x38] sm:$0xff]  }
  0x3c   :  { %v99_v14 = vsel %vm97_vm4, 4286578559, %v95_v12  ;;  %581 = vmatprep.subr.bf16.mxu0 %v757_v1  ;;  %v100_v15 = vsel %vm98_vm6, 4286578559, %v96_v13  ;;  %564 = vmatpush3.bf16.msra.mxu1 %v625_v11  ;;  %v633_v47 = vld [vmem:[#allocation8 + $0x30] sm:$0xff]   ;;  %v634_v48 = vld [vmem:[#allocation8 + $0x28] sm:$0xff]  }
  0x3d   :  { %v510_v16 = vcombine.low %v99_v14, %v100_v15  ;;  %565 = vmatprep.subr.bf16.mxu1 %v757_v1  ;;  %v114_v29 = vrot.slane %v105_v26, %v113_v27  ;;  %v635_v49 = vld [vmem:[#allocation8 + $0x20] sm:$0xff]   ;;  %v636_v50 = vld [vmem:[#allocation8 + $0x18] sm:$0xff]   ;;  %v637_v51 = vld [vmem:[#allocation8 + $0x10] sm:$0xff]   ;;  %s496_s29 = sshll.u32 %s760_s28, 4  ;;  %s497_s29 = int_to_ptr.vmem [resolvable:$true] %s496_s29 }
  0x3e   :  { %v638_v52 = vld [vmem:[#allocation8 + $0x8] sm:$0xff]   ;;  %v639_v53 = vld [vmem:[#allocation8] sm:$0xff]   ;;  %v516_v61 = vld [vmem:[%s875_s4] ss:$0 sm:$0xff]  ;;  %s720_s30 = scalar_lea.vmem %s497_s29, 128  ;;  %p725_p9 = scmp.lt.s32.totalorder %s497_s29, %s497_s29 }
  0x3f   :  { %515 = vmatmul.mubr.msk.bf16.vlgmr.msra.gmra.mxu0 %vm142_vm5, %v510_v16  ;;  %v525_v10 = vld [vmem:[%s877_s6] ss:$0 sm:$0xff]  ;;  %p721_p8 = scmp.ne.s32.totalorder %s497_s29, %s720_s30  ;;  %p726_p10 = scmp.lt.s32.totalorder %s720_s30, %s720_s30 }
  0x40   :  { %566 = vmatpush3.bf16.msra.mxu1 %v626_v17  ;;  %597 = vmatprep.mubr.msk.bf16.mxu0 %vm758_vm7, %v757_v1 }
  0x41   :  { %567 = vmatprep.subr.bf16.mxu1 %v757_v1  ;;  %582 = vmatpush3.bf16.msra.mxu0 %v632_v46  ;;  %p727_p11 = por %p726_p10, %p725_p9 }
  0x42   :  { %583 = vmatprep.subr.bf16.mxu0 %v757_v1 }
  0x43   :  { %p728_p12 = pnand %p727_p11, %p721_p8 }
  0x44   :  { %568 = vmatpush3.bf16.msra.mxu1 %v627_v18 }
  0x45   :  { %569 = vmatprep.subr.bf16.mxu1 %v757_v1  ;;  %584 = vmatpush3.bf16.msra.mxu0 %v633_v47 }
  0x46   :  { %585 = vmatprep.subr.bf16.mxu0 %v757_v1 }
  0x48   :  { %570 = vmatpush3.bf16.msra.mxu1 %v628_v19 }
  0x49   :  { %571 = vmatprep.subr.bf16.mxu1 %v757_v1  ;;  %586 = vmatpush3.bf16.msra.mxu0 %v634_v48 }
  0x4a   :  { %587 = vmatprep.subr.bf16.mxu0 %v757_v1 }
  0x4c   :  { %572 = vmatpush3.bf16.msra.mxu1 %v629_v20 }
  0x4d   :  { %573 = vmatprep.subr.bf16.mxu1 %v757_v1  ;;  %588 = vmatpush3.bf16.msra.mxu0 %v635_v49 }
  0x4e   :  { %589 = vmatprep.subr.bf16.mxu0 %v757_v1 }
  0x50   :  { %574 = vmatpush3.bf16.msra.mxu1 %v630_v21 }
  0x51   :  { %575 = vmatprep.subr.bf16.mxu1 %v757_v1  ;;  %590 = vmatpush3.bf16.msra.mxu0 %v636_v50 }
  0x52   :  { %591 = vmatprep.subr.bf16.mxu0 %v757_v1 }
  0x54   :  { %576 = vmatpush3.bf16.msra.mxu1 %v631_v22 }
  0x55   :  { %592 = vmatpush3.bf16.msra.mxu0 %v637_v51 }
  0x56   :  { %593 = vmatprep.subr.bf16.mxu0 %v757_v1 }
  0x59   :  { %594 = vmatpush3.bf16.msra.mxu0 %v638_v52 }
  0x5a   :  { %595 = vmatprep.subr.bf16.mxu0 %v757_v1 }
  0x5d   :  { %596 = vmatpush3.bf16.msra.mxu0 %v639_v53 }
  0xff   :  { %v180_v30 = vpop.f32.mrf.mxu0 }
 0x100   :  { %v181_v31 = vadd.f32 %v180_v30, %v110_v28 }
 0x101   :  { %v182_v32 = vpop.f32.mrf.mxu0 }
 0x102   :  { %v836_v33 = vadd.f32 %v182_v32, %v114_v29  ;;  %v206_v35 = vmul.f32 0.2, %v181_v31 }
 0x103   :  { %v184_v34 = vpop.f32.mrf.mxu0 }
 0x104   :  { %vm189_vm8 = vweird.f32 %v836_v33  ;;  %v185_v36 = vadd.f32 %v184_v34, %v110_v28  ;;  %v208_v40 = vmax.f32 %v181_v31, %v206_v35 }
 0x105   :  { %v186_v37 = vpop.f32.mrf.mxu0  ;;  %vm191_vm10 = vmxor %vm189_vm8, %vm759_vm9 }
 0x106   :  { %v207_v38 = vmul.f32 0.2, %v185_v36  ;;  %v839_v39 = vadd.f32 %v186_v37, %v114_v29  ;;  %v193_v43 = vsel %vm191_vm10, 1.0, %v757_v1 }
 0x108   :  { %v209_v41 = vmax.f32 %v185_v36, %v207_v38  ;;  %vm190_vm11 = vweird.f32 %v839_v39 }
 0x109   :  { %vm192_vm12 = vmxor %vm190_vm11, %vm759_vm9 }
 0x10a   :  { %v210_v42 = vpack.c.bf16 %v209_v41, %v208_v40  ;;  %v194_v44 = vsel %vm192_vm12, 1.0, %v757_v1 }
 0x10b   :  { %v195_v45 = vmin.f32 %v193_v43, %v194_v44 }
 0x10c   :  { %578 = vmatmul.mubr.bf16.vlgmr.msra.gmra.mxu1 %v210_v42 }
 0x10d   :  { %196 = vmin.xlane.f32.xlu0 %v195_v45 }
 0x196   :  { %v197_v54 = vpop.xlane.xlu0 %196 }
 0x197   :  { %v198_v55 = vrot.slane %v197_v54, 4 }
 0x199   :  { %v199_v56 = vmin.f32 %v197_v54, %v198_v55 }
 0x19b   :  { %v200_v57 = vrot.slane %v199_v56, 2 }
 0x19d   :  { %v201_v58 = vmin.f32 %v199_v56, %v200_v57 }
 0x19f   :  { %v202_v59 = vrot.slane %v201_v58, 1 }
 0x1a1   :  { %v203_v60 = vmin.f32 %v201_v58, %v202_v59 }
 0x1a3   :  { %601 = vpush %v203_v60 }
 0x1cc   :  { %v316_v62 = vpop.f32.mrf.mxu1 }
 0x1cd   :  { %v317_v63 = vadd.f32 %v516_v61, %v316_v62 }
 0x1ce   :  { %v579_v0 = vpop.f32.mrf.mxu1 }
 0x1cf   :  { %v323_v3 = vmul.f32 0.2, %v317_v63 }
 0x1d0   :  { %v319_v2 = vpop.f32.mrf.mxu1 }
 0x1d1   :  { %v320_v4 = vadd.f32 %v516_v61, %v319_v2  ;;  %v325_v7 = vmax.f32 %v317_v63, %v323_v3 }
 0x1d2   :  { %v580_v5 = vpop.f32.mrf.mxu1 }
 0x1d3   :  { %v324_v6 = vmul.f32 0.2, %v320_v4 }
 0x1d4   :  { %s602_s4 = spop %601 }
 0x1d5   :  { %v326_v8 = vmax.f32 %v320_v4, %v324_v6  ;;  %p205_p6 = scmp.gt.f32.partialorder %s602_s4, 0.0 }
 0x1d7   :  { %v327_v9 = vpack.c.bf16 %v326_v8, %v325_v7  ;;  %s462_s6 = scalar_select %p205_p6, 1, 0 }
 0x1d9   :  { %598 = vmatmul.mubr.bf16.vlgmr.msra.gmra.mxu0 %v327_v9  ;;  %v463_v27 = vstv %s462_s6 }
 0x1da   :  { %vm464_vm1 = vcmp.eq.s32.totalorder %v463_v27, 1 }
 0x1db   :  { %v466_v29 = vsel %vm464_vm1, %v839_v39, 0.0 }
 0x299   :  { %v433_v11 = vpop.f32.mrf.mxu0 }
 0x29a   :  { %v434_v12 = vadd.f32 %v525_v10, %v433_v11 }
 0x29b   :  { %v599_v13 = vpop.f32.mrf.mxu0 }
 0x29c   :  { %vm440_vm13 = vweird.f32 %v434_v12 }
 0x29d   :  { %v436_v14 = vpop.f32.mrf.mxu0  ;;  %vm442_vm14 = vmxor %vm440_vm13, %vm759_vm9 }
 0x29e   :  { %v437_v15 = vadd.f32 %v525_v10, %v436_v14  ;;  %v444_v17 = vsel %vm442_vm14, 1.0, %v757_v1 }
 0x29f   :  { %v600_v16 = vpop.f32.mrf.mxu0 }
 0x2a0   :  { %vm441_vm15 = vweird.f32 %v437_v15 }
 0x2a1   :  { %vm443_vm0 = vmxor %vm441_vm15, %vm759_vm9 }
 0x2a2   :  { %v445_v18 = vsel %vm443_vm0, 1.0, %v757_v1  ;;  %v465_v1 = vsel %vm464_vm1, %v836_v33, 0.0 }
 0x2a3   :  { %v446_v19 = vmin.f32 %v444_v17, %v445_v18 }
 0x2a5   :  { %447 = vmin.xlane.f32.xlu0 %v446_v19 }
 0x32e   :  { %v448_v20 = vpop.xlane.xlu0 %447 }
 0x32f   :  { %v449_v21 = vrot.slane %v448_v20, 4 }
 0x331   :  { %v450_v22 = vmin.f32 %v448_v20, %v449_v21 }
 0x333   :  { %v451_v23 = vrot.slane %v450_v22, 2 }
 0x335   :  { %v452_v24 = vmin.f32 %v450_v22, %v451_v23 }
 0x337   :  { %v453_v25 = vrot.slane %v452_v24, 1 }
 0x339   :  { %v454_v26 = vmin.f32 %v452_v24, %v453_v25 }
 0x33b   :  { %603 = vpush %v454_v26 }
 0x36c   :  { %s604_s26 = spop %603 }
 0x36d   :  { %p456_p7 = scmp.gt.f32.partialorder %s604_s26, 0.0 }
 0x36f   :  { %s457_s27 = scalar_select %p456_p7, 1, 0 }
 0x371   :  { %v458_v28 = vstv %s457_s27 }
 0x372   :  { %vm459_vm2 = vcmp.eq.s32.totalorder %v458_v28, 1 }
 0x373   :  { %v460_v30 = vsel %vm459_vm2, %v434_v12, 0.0  ;;  %v461_v31 = vsel %vm459_vm2, %v437_v15, 0.0 }
 0x374   :  { %v467_v32 = vadd.f32 %v465_v1, %v460_v30  ;;  %v468_v34 = vadd.f32 %v466_v29, %v461_v31 }
 0x376   :  { %vm469_vm3 = vcmp.ne.f32.partialorder %v467_v32, %v467_v32  ;;  %vm470_vm4 = vcmp.ne.f32.partialorder %v468_v34, %v468_v34 }
 0x377   :  { %v471_v35 = vsel %vm469_vm3, 0.0, %v467_v32  ;;  %v472_v36 = vsel %vm470_vm4, 0.0, %v468_v34 }
 0x378   :  { %vm473_vm5 = vcmp.eq.f32.partialorder %v471_v35, inf  ;;  %vm474_vm6 = vcmp.eq.f32.partialorder %v472_v36, inf }
 0x379   :  { %v475_v37 = vsel %vm473_vm5, 3.4028235e+38, %v471_v35  ;;  %v476_v38 = vsel %vm474_vm6, 3.4028235e+38, %v472_v36 }
 0x37a   :  { %vm477_vm7 = vcmp.eq.f32.partialorder %v475_v37, -inf  ;;  %vm478_vm8 = vcmp.eq.f32.partialorder %v476_v38, -inf }
 0x37b   :  { %v479_v40 = vsel %vm477_vm7, -3.4028235e+38, %v475_v37  ;;  %v480_v33 = vsel %vm478_vm8, -3.4028235e+38, %v476_v38 }
 0x37c   :  { %v541_v41 = vpack.c.bf16 %v480_v33, %v479_v40 }
 0x37e   :  { %542 = vst [vmem:[#allocation10] sm:$0xff] %v541_v41  }
 0x37f   :  { %731 = shalt.err (!%p728_p12)
}
 0x380   :  { %502 = dma.vmem_to_hbm [thread:$0]  %s497_s29, 128, %s878_s7, [#allocation4], %s752_s11, %s752_s11, %s753_s12  }
 0x381   :  { %746 = dma.done.wait [#allocation4], 128  }
 0x382   :  { %747 = vsyncadd [#allocation4], 4294967168 }
 0x383   :  { %506 = vsyncpa [#allocation3], 1 }
 0x384   :  { %507 = vsyncpa [#allocation6], 1 }
 0x385   :  { %508 = vsyncpa [#allocation9], 1 }
 0x386   :  { %509 = vsyncpa [#allocation4], 1 }

</bundles_post_ra>
